<compile_context>
chip_gen: v5e
topology: v5e:2x2
jax: 0.10.0
libtpu: 0.0.40
codegen_flags: <defaults>
</compile_context>

<pallas_src>
import jax
import jax.numpy as jnp
from jax import lax
from jax.experimental import pallas as pl
from jax.experimental.pallas import tpu as pltpu

# Contract the last dim of both operands (A @ B^T), as used by flash-attention.
_NT_DIMS = (((1,), (1,)), ((), ()))

# Epilogue chunk: rows of the tile processed (and output lanes stored) at once.
# Multiple of 128 so full-chunk stores are unmasked and lane-aligned.
_CHUNK = 1024


def _disc_kernel(h_ref, y_ref, w1h_ref, w1y_ref, b1_ref, w2r_ref, b2_ref, o_ref):
    # h_ref:  (tm, h_size)    y_ref: (tm, y_size)
    # w1h:    (h_size, 64)    w1y:   (y_size, 64)    b1: (1, 64)
    # w2r:    (8, 64)  -- Linear(64,1) weight row replicated on 8 sublanes
    # b2:     (1, 1)
    # o_ref:  (1, tm)  -- lane-dense output row for this tile
    tm_blk = h_ref.shape[0]

    # Hoist the tiny, grid-resident weights out of the chunk loop (a handful of
    # vregs held across the whole tile).
    w1h = w1h_ref[...]
    w1y = w1y_ref[...]
    b1 = b1_ref[...]
    w2r = w2r_ref[...]
    b2 = b2_ref[...]

    def chunk(start, size):
        # Static slices of the VMEM block refs: only (size, feat) enters compute.
        hc = h_ref[start:start + size, :]
        yc = y_ref[start:start + size, :]
        h1 = (
            jnp.dot(hc, w1h, preferred_element_type=jnp.float32)
            + jnp.dot(yc, w1y, preferred_element_type=jnp.float32)
            + b1
        )
        h1 = jnp.maximum(h1, 0.0)  # ReLU
        # (8, 64) . (size, 64)^T -> (8, size); all 8 rows identical, keep row 0
        # so the chunk result is already lane-major (no in-kernel transpose).
        h2 = lax.dot_general(
            w2r, h1, dimension_numbers=_NT_DIMS,
            preferred_element_type=jnp.float32,
        )
        o_ref[:, start:start + size] = jax.nn.sigmoid(h2[0:1, :] + b2).astype(
            o_ref.dtype
        )

    # Statically unrolled chunk loop (tm_blk is a compile-time constant): bounds
    # vreg/VMEM pressure of the epilogue and keeps every store lane-aligned.
    n_full, rem = divmod(tm_blk, _CHUNK)
    for c in range(n_full):
        chunk(c * _CHUNK, _CHUNK)
    if rem:
        chunk(n_full * _CHUNK, rem)


def graph_edge_lstm_discriminator(h, y, params, *, tm=8192,
                                  vmem_budget_bytes=40 << 20):
    """Pallas implementation of GraphEdgeLSTMDiscriminator.forward.

    h: (B, S, h_size) float32, y: (B, S, y_size) float32 -> (B, S, 1) float32
    """
    w1, b1, w2, b2 = params["w1"], params["b1"], params["w2"], params["b2"]
    B, S, h_size = h.shape
    y_size = y.shape[2]
    hidden = w1.shape[1]
    M = B * S

    # Free reshapes (row-major contiguity preserved, no HBM copy of note).
    hf = h.reshape(M, h_size)
    yf = y.reshape(M, y_size)

    # Split W1 by rows so no [h, y] concat is ever materialized in HBM.
    w1h = w1[:h_size]
    w1y = w1[h_size:]
    # Replicate the single Linear(64,1) weight row across a full sublane tile
    # so the second matmul has an aligned (8, 64) LHS.
    w2r = jnp.broadcast_to(w2.reshape(1, hidden), (8, hidden))

    # ---- generation-aware row-tile sizing -----------------------------------
    # VMEM bytes per tile row: double-buffered h/y input blocks (lane-padded to
    # 128 lanes in VMEM) + the (1, tm) output block (padded to 8 sublanes).
    lanes = 128
    padl = lambda n: -(-n // lanes) * lanes
    bytes_per_row = 2 * 4 * (padl(h_size) + padl(y_size)) + 2 * 4 * 8
    tm_cap = max(_CHUNK, (vmem_budget_bytes // bytes_per_row) // _CHUNK * _CHUNK)
    tm_req = min(max(int(tm), 128), tm_cap)

    if M <= tm_req:
        tm_eff = -(-M // 8) * 8            # single tile: sublane-aligned
        grid_m = 1
    else:
        tm_eff = -(-tm_req // 128) * 128   # multi-tile: lane-aligned (1, tm) out
        grid_m = pl.cdiv(M, tm_eff)
        # v7x megacore: prefer an even tile count so both TensorCores get equal
        # work under dimension_semantics=("parallel",). No-op on v5e/v6e.
        if grid_m > 1 and grid_m % 2 == 1:
            tm_eff = -(-pl.cdiv(M, grid_m + 1) // 128) * 128
            grid_m = pl.cdiv(M, tm_eff)
    m_pad = grid_m * tm_eff               # output-only padding; inputs untouched

    # Explicit VMEM limit: estimate + slack for weights / per-chunk h1/h2 temps.
    # Stays >= the 16/32 MiB scoped defaults and well under v7x's 64 MiB VMEM.
    est_vmem = tm_eff * bytes_per_row + (6 << 20)
    vmem_limit = int(min(max(est_vmem, 32 << 20), 48 << 20))

    # Advisory cost: this kernel is HBM-read bound (~M*(48+1)*4 bytes).
    cost = pl.CostEstimate(
        flops=2 * M * (h_size + y_size) * hidden + 2 * M * hidden,
        transcendentals=M,
        bytes_accessed=M * (h_size + y_size + 1) * 4
        + (h_size + y_size + 1) * hidden * 4,
    )

    out = pl.pallas_call(
        _disc_kernel,
        out_shape=jax.ShapeDtypeStruct((1, m_pad), jnp.float32),
        grid_spec=pltpu.PrefetchScalarGridSpec(
            num_scalar_prefetch=0,
            grid=(grid_m,),
            in_specs=[
                pl.BlockSpec((tm_eff, h_size), lambda i: (i, 0)),   # h row tile
                pl.BlockSpec((tm_eff, y_size), lambda i: (i, 0)),   # y row tile
                pl.BlockSpec((h_size, hidden), lambda i: (0, 0)),   # W1[:h]  (resident)
                pl.BlockSpec((y_size, hidden), lambda i: (0, 0)),   # W1[h:]  (resident)
                pl.BlockSpec((1, hidden), lambda i: (0, 0)),        # b1      (resident)
                pl.BlockSpec((8, hidden), lambda i: (0, 0)),        # W2 row  (resident)
                pl.BlockSpec((1, 1), lambda i: (0, 0)),             # b2      (resident)
            ],
            out_specs=pl.BlockSpec((1, tm_eff), lambda i: (0, i)),  # lane-dense out
        ),
        compiler_params=pltpu.CompilerParams(
            dimension_semantics=("parallel",),   # shards row tiles across v7x's 2 TCs
            vmem_limit_bytes=vmem_limit,
        ),
        cost_estimate=cost,
    )(hf, yf, w1h, w1y, b1, w2r, b2)

    return out[0, :M].reshape(B, S, 1)


def init_params(key, h_size, y_size, hidden=64):
    """Deterministic synthetic init matching the PyTorch layer shapes.

    PyTorch: Linear(h_size+y_size, 64).weight -> (64, D); stored here as (D, 64).
             Linear(64, 1).weight -> (1, 64);  stored here as (64, 1).
    """
    D = h_size + y_size
    k1, k2, k3, k4 = jax.random.split(key, 4)
    bound1 = 1.0 / jnp.sqrt(D)
    bound2 = 1.0 / jnp.sqrt(hidden)
    return {
        "w1": jax.random.uniform(k1, (D, hidden), jnp.float32, -bound1, bound1),
        "b1": jax.random.uniform(k2, (1, hidden), jnp.float32, -bound1, bound1),
        "w2": jax.random.uniform(k3, (hidden, 1), jnp.float32, -bound2, bound2),
        "b2": jax.random.uniform(k4, (1, 1), jnp.float32, -bound2, bound2),
    }


def _reference(h, y, params):
    x = jnp.concatenate([h, y], axis=2)
    h1 = jnp.maximum(x @ params["w1"] + params["b1"][0], 0.0)
    return jax.nn.sigmoid(h1 @ params["w2"] + params["b2"][0])


if __name__ == "__main__":
    # Small shapes consistent with the module: h: (B, S, h_size), y: (B, S, y_size)
    B, S, h_size, y_size = 2, 8, 32, 16

    key = jax.random.PRNGKey(0)
    kh, ky, kp = jax.random.split(key, 3)
    h = jax.random.normal(kh, (B, S, h_size), jnp.float32)
    y = jax.random.normal(ky, (B, S, y_size), jnp.float32)
    params = init_params(kp, h_size, y_size)

    out = jax.block_until_ready(graph_edge_lstm_discriminator(h, y, params))
    ref = _reference(h, y, params)
    assert out.shape == (B, S, 1)
    # Tolerance covers the different matmul accumulation split (K=32+16 vs K=48)
    # between the kernel and the XLA reference.
    assert jnp.allclose(out, ref, atol=1e-3, rtol=1e-3), float(
        jnp.max(jnp.abs(out - ref))
    )

    # Single-tile, multi-chunk epilogue with a ragged remainder chunk (M = 2000).
    B2, S2 = 4, 500
    kh2, ky2 = jax.random.split(jax.random.PRNGKey(1), 2)
    h2 = jax.random.normal(kh2, (B2, S2, h_size), jnp.float32)
    y2 = jax.random.normal(ky2, (B2, S2, y_size), jnp.float32)
    out2 = jax.block_until_ready(graph_edge_lstm_discriminator(h2, y2, params))
    ref2 = _reference(h2, y2, params)
    assert out2.shape == (B2, S2, 1)
    assert jnp.allclose(out2, ref2, atol=1e-3, rtol=1e-3), float(
        jnp.max(jnp.abs(out2 - ref2))
    )

    # Multi-tile path with the large default tile (grid > 1, ragged edge tile).
    B3, S3 = 2, 5000  # M = 10000 -> 2 row tiles of 8192, last tile clipped
    kh3, ky3 = jax.random.split(jax.random.PRNGKey(2), 2)
    h3 = jax.random.normal(kh3, (B3, S3, h_size), jnp.float32)
    y3 = jax.random.normal(ky3, (B3, S3, y_size), jnp.float32)
    out3 = jax.block_until_ready(graph_edge_lstm_discriminator(h3, y3, params))
    ref3 = _reference(h3, y3, params)
    assert out3.shape == (B3, S3, 1)
    assert jnp.allclose(out3, ref3, atol=1e-3, rtol=1e-3), float(
        jnp.max(jnp.abs(out3 - ref3))
    )

    print("KERNEL_OK")
</pallas_src>

<mosaic_0001>
module attributes {stable_mosaic.version = 11 : i64} {
  func.func @_disc_kernel(%arg0: i32, %arg1: memref<16x32xf32, #tpu.memory_space<vmem>>, %arg2: memref<16x16xf32, #tpu.memory_space<vmem>>, %arg3: memref<32x64xf32, #tpu.memory_space<vmem>>, %arg4: memref<16x64xf32, #tpu.memory_space<vmem>>, %arg5: memref<1x64xf32, #tpu.memory_space<vmem>>, %arg6: memref<8x64xf32, #tpu.memory_space<vmem>>, %arg7: memref<1x1xf32, #tpu.memory_space<vmem>>, %arg8: memref<1x16xf32, #tpu.memory_space<vmem>>) attributes {dimension_semantics = [#tpu.dimension_semantics<parallel>], iteration_bounds = array<i64: 1>, scalar_prefetch = 0 : i64, scratch_operands = 0 : i64, tpu.core_type = #tpu.core_type<tc>, window_params = [{transform_indices = @transform_0, window_bounds = array<i64: 16, 32>}, {transform_indices = @transform_1, window_bounds = array<i64: 16, 16>}, {pipeline_mode = #tpu.pipeline_mode<synchronous>, transform_indices = @transform_2, window_bounds = array<i64: 32, 64>}, {pipeline_mode = #tpu.pipeline_mode<synchronous>, transform_indices = @transform_3, window_bounds = array<i64: 16, 64>}, {pipeline_mode = #tpu.pipeline_mode<synchronous>, transform_indices = @transform_4, window_bounds = array<i64: 1, 64>}, {pipeline_mode = #tpu.pipeline_mode<synchronous>, transform_indices = @transform_5, window_bounds = array<i64: 8, 64>}, {pipeline_mode = #tpu.pipeline_mode<synchronous>, transform_indices = @transform_6, window_bounds = array<i64: 1, 1>}, {transform_indices = @transform_7, window_bounds = array<i64: 1, 16>}]} {
    %c0 = arith.constant 0 : index
    %c0_0 = arith.constant 0 : index
    %0 = vector.load %arg3[%c0, %c0_0] : memref<32x64xf32, #tpu.memory_space<vmem>>, vector<32x64xf32>
    %c0_1 = arith.constant 0 : index
    %c0_2 = arith.constant 0 : index
    %1 = vector.load %arg4[%c0_1, %c0_2] : memref<16x64xf32, #tpu.memory_space<vmem>>, vector<16x64xf32>
    %c0_3 = arith.constant 0 : index
    %c0_4 = arith.constant 0 : index
    %2 = vector.load %arg5[%c0_3, %c0_4] : memref<1x64xf32, #tpu.memory_space<vmem>>, vector<1x64xf32>
    %c0_5 = arith.constant 0 : index
    %c0_6 = arith.constant 0 : index
    %3 = vector.load %arg6[%c0_5, %c0_6] : memref<8x64xf32, #tpu.memory_space<vmem>>, vector<8x64xf32>
    %c0_7 = arith.constant 0 : index
    %c0_8 = arith.constant 0 : index
    %4 = vector.load %arg7[%c0_7, %c0_8] : memref<1x1xf32, #tpu.memory_space<vmem>>, vector<1x1xf32>
    %c0_9 = arith.constant 0 : index
    %c0_10 = arith.constant 0 : index
    %5 = vector.load %arg1[%c0_9, %c0_10] : memref<16x32xf32, #tpu.memory_space<vmem>>, vector<16x32xf32>
    %c0_11 = arith.constant 0 : index
    %c0_12 = arith.constant 0 : index
    %6 = vector.load %arg2[%c0_11, %c0_12] : memref<16x16xf32, #tpu.memory_space<vmem>>, vector<16x16xf32>
    %cst = arith.constant dense<0.000000e+00> : vector<16x64xf32>
    %7 = tpu.matmul %5, %0, %cst {dimension_numbers = #tpu.dot_dimension_numbers<[1], [0], [0], [1], [0, 0, 1, 1], [], []>} : vector<16x32xf32>, vector<32x64xf32>, vector<16x64xf32> -> vector<16x64xf32>
    %cst_13 = arith.constant dense<0.000000e+00> : vector<16x64xf32>
    %8 = tpu.matmul %6, %1, %cst_13 {dimension_numbers = #tpu.dot_dimension_numbers<[1], [0], [0], [1], [0, 0, 1, 1], [], []>} : vector<16x16xf32>, vector<16x64xf32>, vector<16x64xf32> -> vector<16x64xf32>
    %9 = arith.addf %7, %8 : vector<16x64xf32>
    %10 = vector.broadcast %2 : vector<1x64xf32> to vector<16x64xf32>
    %11 = arith.addf %9, %10 : vector<16x64xf32>
    %cst_14 = arith.constant 0.000000e+00 : f32
    %12 = vector.broadcast %cst_14 : f32 to vector<16x64xf32>
    %13 = arith.maximumf %11, %12 : vector<16x64xf32>
    %cst_15 = arith.constant dense<0.000000e+00> : vector<8x16xf32>
    %14 = tpu.matmul %3, %13, %cst_15 {dimension_numbers = #tpu.dot_dimension_numbers<[1], [1], [0], [0], [0, 0, 1, 0], [], []>} : vector<8x64xf32>, vector<16x64xf32>, vector<8x16xf32> -> vector<8x16xf32>
    %15 = vector.extract_strided_slice %14 {offsets = [0, 0], sizes = [1, 16], strides = [1, 1]} : vector<8x16xf32> to vector<1x16xf32>
    %16 = vector.broadcast %4 : vector<1x1xf32> to vector<1x16xf32>
    %17 = arith.addf %15, %16 : vector<1x16xf32>
    %18 = arith.negf %17 : vector<1x16xf32>
    %19 = math.exp %18 : vector<1x16xf32>
    %cst_16 = arith.constant 1.000000e+00 : f32
    %20 = vector.broadcast %cst_16 : f32 to vector<1x16xf32>
    %21 = arith.addf %20, %19 : vector<1x16xf32>
    %22 = arith.divf %20, %21 : vector<1x16xf32>
    %c0_17 = arith.constant 0 : index
    %c0_18 = arith.constant 0 : index
    %23 = vector.load %arg8[%c0_17, %c0_18] : memref<1x16xf32, #tpu.memory_space<vmem>>, vector<1x16xf32>
    tpu.vector_store %arg8[%c0_17, %c0_18], %22 {strides = array<i32>} : memref<1x16xf32, #tpu.memory_space<vmem>>, vector<1x16xf32>,
    return
  }
  func.func @transform_0(%arg0: i32) -> (i32, i32) {
    %c0_i32 = arith.constant 0 : i32
    %c0_i32_0 = arith.constant 0 : i32
    return %arg0, %c0_i32 : i32, i32
  }
  func.func @transform_1(%arg0: i32) -> (i32, i32) {
    %c0_i32 = arith.constant 0 : i32
    %c0_i32_0 = arith.constant 0 : i32
    return %arg0, %c0_i32 : i32, i32
  }
  func.func @transform_2(%arg0: i32) -> (i32, i32) {
    %c0_i32 = arith.constant 0 : i32
    %c0_i32_0 = arith.constant 0 : i32
    %c0_i32_1 = arith.constant 0 : i32
    return %c0_i32, %c0_i32_0 : i32, i32
  }
  func.func @transform_3(%arg0: i32) -> (i32, i32) {
    %c0_i32 = arith.constant 0 : i32
    %c0_i32_0 = arith.constant 0 : i32
    %c0_i32_1 = arith.constant 0 : i32
    return %c0_i32, %c0_i32_0 : i32, i32
  }
  func.func @transform_4(%arg0: i32) -> (i32, i32) {
    %c0_i32 = arith.constant 0 : i32
    %c0_i32_0 = arith.constant 0 : i32
    %c0_i32_1 = arith.constant 0 : i32
    return %c0_i32, %c0_i32_0 : i32, i32
  }
  func.func @transform_5(%arg0: i32) -> (i32, i32) {
    %c0_i32 = arith.constant 0 : i32
    %c0_i32_0 = arith.constant 0 : i32
    %c0_i32_1 = arith.constant 0 : i32
    return %c0_i32, %c0_i32_0 : i32, i32
  }
  func.func @transform_6(%arg0: i32) -> (i32, i32) {
    %c0_i32 = arith.constant 0 : i32
    %c0_i32_0 = arith.constant 0 : i32
    %c0_i32_1 = arith.constant 0 : i32
    return %c0_i32, %c0_i32_0 : i32, i32
  }
  func.func @transform_7(%arg0: i32) -> (i32, i32) {
    %c0_i32 = arith.constant 0 : i32
    %c0_i32_0 = arith.constant 0 : i32
    return %c0_i32, %arg0 : i32, i32
  }
}

</mosaic_0001>

<bundles_post_ra>
// kernel: tpu_custom_call.1
= control target key start
LH: loop header
LB: loop body
LE: loop exit
PB: predicated region body
PF: predicated region fallthrough
CT: control target
= control target key end

     0   :  { %s514_s0 = inlined_call_operand.hbm [shape: f32[16,32], index: 0, kind: input, shape index: {}]   ;;  %s515_s1 = inlined_call_operand.hbm [shape: f32[16,16], index: 1, kind: input, shape index: {}]   ;;  %s516_s2 = inlined_call_operand.hbm [shape: f32[32,64], index: 2, kind: input, shape index: {}]   ;;  %s517_s3 = inlined_call_operand.hbm [shape: f32[16,64], index: 3, kind: input, shape index: {}]   ;;  %s518_s4 = inlined_call_operand.vmem [shape: f32[1,64], index: 4, kind: input, shape index: {}]   ;;  %s519_s5 = inlined_call_operand.hbm [shape: f32[8,64], index: 5, kind: input, shape index: {}]   ;;  %s520_s6 = inlined_call_operand.<no memory space> [shape: f32[1,1], index: 6, kind: input, shape index: {}]   ;;  %s521_s7 = inlined_call_operand.hbm [shape: f32[1,16], index: 7, kind: output, shape index: {}]  }
   0x1   :  { %v12_v0 = vstv %s520_s6 }
   0x2   :  { %13 = vst [vmem:[#allocation2] sm:$0x1] %v12_v0 }
   0x3   :  { %14 = vsyncpa [#allocation4], 0 }
   0x4   :  { %15 = vsyncpa [#allocation7], 0 }
   0x5   :  { %16 = vsyncpa [#allocation10], 0 }
   0x6   :  { %17 = vsyncpa [#allocation5], 0  ;;  %s35_s28 = sshll.u32 %s515_s1, 4  ;;  %s441_s29 = smov [#allocation6]   ;;  %s36_s28 = int_to_ptr.hbm [resolvable:$true] %s35_s28 }
   0x7   :  { %s37_s30 = sshll.u32 %s441_s29, 4  ;;  %s61_s10 = sshll.u32 %s517_s3, 4  ;;  %s38_s30 = int_to_ptr.vmem [resolvable:$true] %s37_s30  ;;  %s62_s10 = int_to_ptr.hbm [resolvable:$true] %s61_s10 }
   0x8   :  { %s442_s11 = smov 128   ;;  %s443_s12 = smov 8  }
   0x9   :  { %43 = dma.hbm_to_vmem [thread:$0]  %s36_s28, 256, %s38_s30, [#allocation7], %s442_s11, %s442_s11, %s443_s12  }
   0xa   :  { %s444_s6 = smov [#allocation9]   ;;  %s22_s16 = sshll.u32 %s514_s0, 4  ;;  %s23_s16 = int_to_ptr.hbm [resolvable:$true] %s22_s16 }
   0xb   :  { %s63_s13 = sshll.u32 %s444_s6, 4  ;;  %s48_s18 = sshll.u32 %s516_s2, 4  ;;  %s64_s13 = int_to_ptr.vmem [resolvable:$true] %s63_s13  ;;  %s49_s18 = int_to_ptr.hbm [resolvable:$true] %s48_s18 }
   0xc   :  { %69 = dma.hbm_to_vmem [thread:$0]  %s62_s10, 256, %s64_s13, [#allocation10], %s442_s11, %s442_s11, %s443_s12  }
   0xd   :  { %s445_s19 = smov [#allocation3]   ;;  %s446_s3 = smov [#allocation8]  }
   0xe   :  { %s24_s20 = sshll.u32 %s445_s19, 4  ;;  %s50_s21 = sshll.u32 %s446_s3, 4  ;;  %s25_s20 = int_to_ptr.vmem [resolvable:$true] %s24_s20  ;;  %s51_s21 = int_to_ptr.vmem [resolvable:$true] %s50_s21 }
   0xf   :  { %30 = dma.hbm_to_vmem [thread:$0]  %s23_s16, 256, %s25_s20, [#allocation4], %s442_s11, %s442_s11, %s443_s12  }
  0x10   :  { %s77_s24 = sshll.u32 %s519_s5, 4  ;;  %s447_s0 = smov [#allocation11]   ;;  %s78_s24 = int_to_ptr.hbm [resolvable:$true] %s77_s24 }
  0x11   :  { %56 = dma.hbm_to_vmem [thread:$0]  %s49_s18, 512, %s51_s21, [#allocation7], %s442_s11, %s442_s11, %s443_s12  }
  0x12   :  { %s79_s25 = sshll.u32 %s447_s0, 4  ;;  %s80_s25 = int_to_ptr.vmem [resolvable:$true] %s79_s25 }
  0x13   :  { %82 = dma.hbm_to_vmem [thread:$0]  %s78_s24, 128, %s80_s25, [#allocation10]  }
  0x14   :  { %433 = dma.done.wait [#allocation4], 256  }
  0x15   :  { %434 = vsyncadd [#allocation4], 4294967040 }
  0x16   :  { %435 = dma.done.wait [#allocation7], 768  }
  0x17   :  { %436 = vsyncadd [#allocation7], 4294966528 }
  0x18   :  { %437 = dma.done.wait [#allocation10], 384  }
  0x19   :  { %438 = vsyncadd [#allocation10], 4294966912  ;;  %v108_v1 = vld [vmem:[#allocation8 + $0x18] sm:$0xff]  ;;  %v110_v2 = vld [vmem:[#allocation9 + $0x8] sm:$0xff]  ;;  %vm118_vm0 = vcmask 130048   ;;  %vm148_vm1 = vcmask 261120  }
  0x1a   :  { %v107_v3 = vld [vmem:[#allocation8 + $0x10] sm:$0xff]  ;;  %167 = vmatpush.msra.mxu1 %v108_v1  ;;  %270 = vmatpush.msra.mxu3 %v108_v1  ;;  %v109_v4 = vld [vmem:[#allocation9] sm:$0xff]  ;;  %v106_v5 = vld [vmem:[#allocation8 + $0x8] sm:$0xff]  ;;  %v448_v12 = vmov 0   ;;  %vm185_vm2 = vcmask 523264   ;;  %s250_s29 = sshll.u32 %s521_s7, 4  ;;  %s251_s29 = int_to_ptr.hbm [resolvable:$true] %s250_s29 }
  0x1b   :  { %139 = vmatpush.msra.mxu0 %v110_v2  ;;  %v116_v6 = vld [vmem:[#allocation6] sm:$0xff]  ;;  %v105_v7 = vld [vmem:[#allocation8] sm:$0xff]  ;;  %v115_v9 = vld [vmem:[#allocation3 + $0x8] sm:$0xff]  ;;  %283 = vset.pattern.permute.xlu0 %v448_v12  ;;  %vm241_vm6 = vcmask 122880  }
  0x1c   :  { %168 = vmatpush.msra.mxu1 %v107_v3  ;;  %271 = vmatpush.msra.mxu3 %v107_v3  ;;  %v114_v8 = vld [vmem:[#allocation3] sm:$0xff]  ;;  %v117_v10 = vld [vmem:[#allocation6 + $0x8] sm:$0xff]  ;;  %v112_v24 = vld [vmem:[#allocation11] sm:$0xff] }
  0x1d   :  { %140 = vmatpush.msra.mxu0 %v109_v4  ;;  %v113_v11 = vld [vmem:[#allocation2] sm:$0x1] }
  0x1e   :  { %169 = vmatpush.msra.mxu1 %v106_v5  ;;  %272 = vmatpush.msra.mxu3 %v106_v5  ;;  %v284_v18 = vld [vmem:[%s518_s4] ss:$0 sm:$0xff]  ;;  %s449_s4 = smov [#allocation12]  }
  0x1f   :  { %262 = vmatmul.msk.f32.vlgmr.msra.gmra.mxu0 %vm118_vm0, %v116_v6  ;;  %217 = vperm.xlu0 %283, %v113_v11   ;;  %s248_s26 = sshll.u32 %s449_s4, 4  ;;  %s249_s26 = int_to_ptr.vmem [resolvable:$true] %s248_s26 }
  0x20   :  { %170 = vmatpush.msra.mxu1 %v105_v7  ;;  %273 = vmatpush.msra.mxu3 %v105_v7 }
  0x21   :  { %264 = vmatmul.msk.f32.vlgmr.msra.gmra.mxu1 %vm148_vm1, %v114_v8  ;;  %265 = vmatmul.msk.f32.vlgmr.msra.gmra.mxu3 %vm148_vm1, %v115_v9 }
  0x27   :  { %263 = vmatmul.msk.f32.gmra.mxu0 %vm118_vm0, %v117_v10 }
  0x91   :  { %v218_v25 = vpop.permute.xlu0 %217 }
  0x92   :  { %v220_v26 = vperm.slane %v218_v25, 0 }
  0x9c   :  { %v142_v13 = vpop.f32.mrf.mxu0 }
  0x9e   :  { %v172_v14 = vpop.f32.mrf.mxu1 }
  0x9f   :  { %v173_v17 = vadd.f32 %v172_v14, %v142_v13 }
  0xa1   :  { %v181_v21 = vadd.f32 %v284_v18, %v173_v17 }
  0xa3   :  { %v183_v23 = vmax.f32 %v181_v21, 0.0 }
  0xa4   :  { %v145_v15 = vpop.f32.mrf.mxu0  ;;  %v175_v16 = vpop.f32.mrf.mxu3 }
  0xa5   :  { %v176_v19 = vadd.f32 %v175_v16, %v145_v15 }
  0xa7   :  { %v182_v20 = vadd.f32 %v284_v18, %v176_v19 }
  0xa9   :  { %v184_v22 = vmax.f32 %v182_v20, 0.0 }
  0xab   :  { %266 = vmatpush.xpose.msk.msra.mxu2 %vm185_vm2, %v184_v22 }
  0xaf   :  { %267 = vmatpush.xpose.msk.msra.mxu2 %vm185_vm2, %v183_v23 }
  0xb2   :  { %268 = vmatmul.msk.f32.vlgmr.msra.gmra.mxu2 %vm185_vm2, %v112_v24 }
 0x135   :  { %v212_v27 = vpop.f32.mrf.mxu2 }
 0x136   :  { %v221_v28 = vadd.f32 %v220_v26, %v212_v27 }
 0x138   :  { %v269_v29 = vmul.f32 -1.442695, %v221_v28 }
 0x13a   :  { %285 = vpow2.f32 %v269_v29 }
 0x140   :  { %v286_v30 = vpop.eup %285 }
 0x141   :  { %v225_v31 = vadd.f32 1.0, %v286_v30 }
 0x143   :  { %287 = vrcp.f32 %v225_v31  ;;  %v237_v35 = vand.u32 2147483648, %v225_v31  ;;  %v235_v37 = vand.u32 2147483647, %v225_v31  ;;  %vm231_vm4 = vweird.f32 %v225_v31 }
 0x145   :  { %v238_v39 = vor.u32 1.1754944e-38, %v237_v35  ;;  %vm236_vm7 = vcmp.eq.f32.partialorder %v235_v37, 8.507059e+37 }
 0x149   :  { %v288_v32 = vpop.eup %287 }
 0x14a   :  { %v227_v33 = vmul.f32 %v288_v32, %v225_v31  ;;  %vm232_vm3 = vweird.f32 %v288_v32 }
 0x14b   :  { %vm233_vm5 = vmor %vm231_vm4, %vm232_vm3 }
 0x14c   :  { %v228_v34 = vsub.f32 1.0, %v227_v33 }
 0x14e   :  { %v229_v36 = vmul.f32 %v288_v32, %v228_v34 }
 0x150   :  { %v230_v38 = vadd.f32 %v288_v32, %v229_v36 }
 0x152   :  { %v234_v40 = vsel %vm233_vm5, %v288_v32, %v230_v38 }
 0x153   :  { %v239_v41 = vsel %vm236_vm7, %v238_v39, %v234_v40 }
 0x154   :  { %242 = vst.msk [vmem:[#allocation12] sm:$0x1] %vm241_vm6, %v239_v41 }
 0x155   :  { %253 = dma.vmem_to_hbm [thread:$0]  %s249_s26, 16, %s251_s29, [#allocation5]  }
 0x156   :  { %439 = dma.done.wait [#allocation5], 16  }
 0x157   :  { %440 = vsyncadd [#allocation5], 4294967280 }
 0x158   :  { %258 = vsyncpa [#allocation4], 1 }
 0x159   :  { %259 = vsyncpa [#allocation7], 1 }
 0x15a   :  { %260 = vsyncpa [#allocation10], 1 }
 0x15b   :  { %261 = vsyncpa [#allocation5], 1 }

</bundles_post_ra>
